<compile_context>
chip_gen: v6e
topology: v6e:2x2x1
jax: 0.10.0
libtpu: 0.0.40
codegen_flags: <defaults>
</compile_context>

<pallas_src>
import functools

import jax
import jax.numpy as jnp
from jax.experimental import pallas as pl
from jax.experimental.pallas import tpu as pltpu


# ---- higher-order activations: combine k slabs elementwise (VPU/EUP only) ----
def _act_max(slabs):
    return functools.reduce(jnp.maximum, slabs)


def _act_l2(slabs):
    acc = None
    for t in slabs:
        tf = t.astype(jnp.float32)          # square & accumulate in f32 (bf16 safe)
        acc = tf * tf if acc is None else acc + tf * tf
    return jnp.sqrt(acc)


ACTFUNS = (_act_max, _act_l2)


# ----------------------------- Pallas kernels ---------------------------------
def _kernel_lane_packed(x_ref, o_ref, *, k, s, actfuns):
    # Fast path (S % 128 == 0).
    #   x_ref block: (tn, L, tg, k*S)   o_ref block: (tn, L, tg, S)
    # Both activations run in this single grid step (no program_id dispatch).
    # Slab j is a ref-level slice at the static, 128-aligned lane offset j*S:
    # aligned unmasked loads, lane-dense stores, and only one slab live at a
    # time instead of the whole 2S-wide block value.
    for i, f in enumerate(actfuns):
        slabs = [x_ref[:, i, :, pl.ds(j * s, s)] for j in range(k)]
        o_ref[:, i, :, :] = f(slabs).astype(o_ref.dtype)


def _kernel_sublane(x_ref, o_ref, *, k, tg, actfuns):
    # General path (S % 128 != 0, e.g. 7x7 / 14x14 spatial).
    #   x_ref block: (tn, L, tg*k, S)   o_ref block: (tn, L, tg, S)
    # The k members of each group are interleaved on the SUBLANE axis, so the
    # lane axis stays dense at full width S for both loads and stores; slab j
    # is a sublane-strided ref slice (stride = k), avoiding unaligned lane
    # slices and masked partial stores.
    for i, f in enumerate(actfuns):
        slabs = [x_ref[:, i, pl.ds(j, tg, stride=k), :] for j in range(k)]
        o_ref[:, i, :, :] = f(slabs).astype(o_ref.dtype)


# ----------------------------- tile selection ---------------------------------
def _cdiv(a, b):
    return -(-a // b)


def _pick_tiles(N, G, in_bytes_per_ng, *, target_in_bytes, min_block_bytes,
                min_grid_steps):
    """Pick (tn, tg).

    tg sits in the sublane position of both blocks, so it must be a multiple of
    8 or the full G.  Neither N nor G needs to divide evenly -- the grid uses
    cdiv with (masked) partial last blocks -- so prime/odd shapes don't drop
    into the tiny-block regime.  Blocks are then shrunk only as far as needed
    to keep >= min_grid_steps steps (megacore sharding + DMA/compute overlap on
    v7x), never below ~min_block_bytes.
    """
    if G <= 8 or G * in_bytes_per_ng <= target_in_bytes:
        tg = G                                        # grow tg to full G first
    else:
        tg = min(G, max(8, (target_in_bytes // in_bytes_per_ng) // 8 * 8))
    tn = min(N, max(1, target_in_bytes // (tg * in_bytes_per_ng)))

    for _ in range(64):
        if _cdiv(N, tn) * _cdiv(G, tg) >= min_grid_steps:
            break
        if tn * tg * in_bytes_per_ng <= 2 * min_block_bytes:
            break                                     # don't enter tiny-block regime
        if tn > 1:
            tn = _cdiv(tn, 2)
        elif tg > 8:
            tg = max(8, _cdiv(tg // 2, 8) * 8)
        else:
            break
    return tn, tg


# ------------------------------- wrapper --------------------------------------
def multi_actfun_partition(x, *, k=2, actfuns=ACTFUNS,
                           target_block_bytes=8 * 1024 * 1024,
                           min_block_bytes=2 * 1024 * 1024,
                           min_grid_steps=16):
    N, C, H, W = x.shape
    L = len(actfuns)
    if C % (k * L) != 0:
        raise ValueError(
            f"Channel dim {C} not divisible by divisor {k * L} (k={k}, L={L}).")
    Ck = C // k          # channels after unroll_k (= output channels)
    G = Ck // L          # channel-groups handled by each actfun
    S = H * W
    isz = jnp.dtype(x.dtype).itemsize

    # Bytes of input per (single n, single group) covering all L activations.
    in_bytes_per_ng = L * k * S * isz
    tn, tg = _pick_tiles(N, G, in_bytes_per_ng,
                         target_in_bytes=target_block_bytes,
                         min_block_bytes=min_block_bytes,
                         min_grid_steps=min_grid_steps)
    grid = (_cdiv(N, tn), _cdiv(G, tg))

    if S % 128 == 0:
        # FREE reshape: (N, C, H, W) = (N, L*G*k, H, W) -> (N, L, G, k*S).
        # k folded into the LANE axis; slab offsets j*S are 128-aligned.
        x_r = x.reshape(N, L, G, k * S)
        in_spec = pl.BlockSpec((tn, L, tg, k * S), lambda n, g: (n, 0, g, 0))
        kernel = functools.partial(_kernel_lane_packed, k=k, s=S, actfuns=actfuns)
    else:
        # FREE reshape: -> (N, L, G*k, S).  Lane axis stays dense at width S;
        # k interleaved on the sublane axis (strided slabs inside the kernel).
        x_r = x.reshape(N, L, G * k, S)
        in_spec = pl.BlockSpec((tn, L, tg * k, S), lambda n, g: (n, 0, g, 0))
        kernel = functools.partial(_kernel_sublane, k=k, tg=tg, actfuns=actfuns)

    in_block_bytes = tn * L * tg * k * S * isz
    out_block_bytes = tn * L * tg * S * isz
    # Double-buffered in+out footprint plus headroom.  Raise the scoped-VMEM
    # limit explicitly (v5e default is only 16 MiB); the default 8 MiB target
    # keeps this at ~32 MiB, inside v7x's 64 MiB physical VMEM.
    vmem_limit = min(128 * 1024 * 1024,
                     max(32 * 1024 * 1024,
                         2 * (in_block_bytes + out_block_bytes) + 4 * 1024 * 1024))
    # TODO(synk): for extreme spatial sizes where even a (tn=1, tg=8) block
    # exceeds VMEM, the lane axis itself would need tiling; not needed here.

    out = pl.pallas_call(
        kernel,
        out_shape=jax.ShapeDtypeStruct((N, L, G, S), x.dtype),
        grid=grid,
        in_specs=[in_spec],
        out_specs=pl.BlockSpec((tn, L, tg, S), lambda n, g: (n, 0, g, 0)),
        compiler_params=pltpu.CompilerParams(
            dimension_semantics=("parallel", "parallel"),
            vmem_limit_bytes=int(vmem_limit)),
    )(x_r)

    # FREE reshape back: (N, L, G, S) -> (N, C//k, H, W).  Flattening (L, G) as
    # the channel axis reproduces torch.cat(dim=1) order.
    return out.reshape(N, Ck, H, W)


# ------------------------------ pure-JAX reference ----------------------------
def _reference(x, *, k=2):
    N, C, H, W = x.shape
    L = 2
    xr = x.reshape(N, C // k, k, H, W)                 # unroll_k, d_new = 2
    G = (C // k) // L
    chunk0 = xr[:, 0 * G:1 * G]
    chunk1 = xr[:, 1 * G:2 * G]
    out0 = jnp.max(chunk0, axis=2)
    out1 = jnp.sqrt(jnp.sum(chunk1.astype(jnp.float32) ** 2, axis=2)).astype(x.dtype)
    return jnp.concatenate([out0, out1], axis=1)


if __name__ == "__main__":
    key = jax.random.PRNGKey(0)
    # batch=2, channels=8 (divisible by divisor k * len(actfuns) = 4),
    # spatial 16x16 (S = 256, exercises the lane-aligned fast path).
    x = jax.random.normal(key, (2, 8, 16, 16), dtype=jnp.float32)

    y = multi_actfun_partition(x, k=2)
    jax.block_until_ready(y)

    y_ref = _reference(x, k=2)
    assert y.shape == (2, 4, 16, 16), y.shape
    assert jnp.allclose(y, y_ref, atol=1e-5, rtol=1e-5), "mismatch vs reference"
    print("KERNEL_OK")
</pallas_src>

<mosaic_0001>
module attributes {stable_mosaic.version = 11 : i64} {
  func.func @_kernel_lane_packed(%arg0: i32, %arg1: i32, %arg2: memref<2x2x2x512xf32, #tpu.memory_space<vmem>>, %arg3: memref<2x2x2x256xf32, #tpu.memory_space<vmem>>) attributes {dimension_semantics = [#tpu.dimension_semantics<parallel>, #tpu.dimension_semantics<parallel>], iteration_bounds = array<i64: 1, 1>, scalar_prefetch = 0 : i64, scratch_operands = 0 : i64, tpu.core_type = #tpu.core_type<tc>, window_params = [{transform_indices = @transform_0, window_bounds = array<i64: 2, 2, 2, 512>}, {transform_indices = @transform_1, window_bounds = array<i64: 2, 2, 2, 256>}]} {
    %c0 = arith.constant 0 : index
    %c0_0 = arith.constant 0 : index
    %c0_1 = arith.constant 0 : index
    %c0_2 = arith.constant 0 : index
    %0 = vector.load %arg2[%c0, %c0_0, %c0_1, %c0_2] : memref<2x2x2x512xf32, #tpu.memory_space<vmem>>, vector<2x1x2x256xf32>
    %1 = vector.shape_cast %0 : vector<2x1x2x256xf32> to vector<2x2x256xf32>
    %c0_3 = arith.constant 0 : index
    %c0_4 = arith.constant 0 : index
    %c0_5 = arith.constant 0 : index
    %c256 = arith.constant 256 : index
    %2 = vector.load %arg2[%c0_3, %c0_4, %c0_5, %c256] : memref<2x2x2x512xf32, #tpu.memory_space<vmem>>, vector<2x1x2x256xf32>
    %3 = vector.shape_cast %2 : vector<2x1x2x256xf32> to vector<2x2x256xf32>
    %4 = arith.maximumf %1, %3 : vector<2x2x256xf32>
    %c0_6 = arith.constant 0 : index
    %c0_7 = arith.constant 0 : index
    %c0_8 = arith.constant 0 : index
    %c0_9 = arith.constant 0 : index
    %5 = vector.load %arg3[%c0_6, %c0_7, %c0_8, %c0_9] : memref<2x2x2x256xf32, #tpu.memory_space<vmem>>, vector<2x1x2x256xf32>
    %6 = vector.shape_cast %5 : vector<2x1x2x256xf32> to vector<2x2x256xf32>
    %7 = vector.shape_cast %4 : vector<2x2x256xf32> to vector<2x1x2x256xf32>
    tpu.vector_store %arg3[%c0_6, %c0_7, %c0_8, %c0_9], %7 {strides = array<i32>} : memref<2x2x2x256xf32, #tpu.memory_space<vmem>>, vector<2x1x2x256xf32>,
    %c0_10 = arith.constant 0 : index
    %c1 = arith.constant 1 : index
    %c0_11 = arith.constant 0 : index
    %c0_12 = arith.constant 0 : index
    %8 = vector.load %arg2[%c0_10, %c1, %c0_11, %c0_12] : memref<2x2x2x512xf32, #tpu.memory_space<vmem>>, vector<2x1x2x256xf32>
    %9 = vector.shape_cast %8 : vector<2x1x2x256xf32> to vector<2x2x256xf32>
    %c0_13 = arith.constant 0 : index
    %c1_14 = arith.constant 1 : index
    %c0_15 = arith.constant 0 : index
    %c256_16 = arith.constant 256 : index
    %10 = vector.load %arg2[%c0_13, %c1_14, %c0_15, %c256_16] : memref<2x2x2x512xf32, #tpu.memory_space<vmem>>, vector<2x1x2x256xf32>
    %11 = vector.shape_cast %10 : vector<2x1x2x256xf32> to vector<2x2x256xf32>
    %12 = arith.mulf %9, %9 : vector<2x2x256xf32>
    %13 = arith.mulf %11, %11 : vector<2x2x256xf32>
    %14 = arith.addf %12, %13 : vector<2x2x256xf32>
    %15 = math.sqrt %14 : vector<2x2x256xf32>
    %c0_17 = arith.constant 0 : index
    %c1_18 = arith.constant 1 : index
    %c0_19 = arith.constant 0 : index
    %c0_20 = arith.constant 0 : index
    %16 = vector.load %arg3[%c0_17, %c1_18, %c0_19, %c0_20] : memref<2x2x2x256xf32, #tpu.memory_space<vmem>>, vector<2x1x2x256xf32>
    %17 = vector.shape_cast %16 : vector<2x1x2x256xf32> to vector<2x2x256xf32>
    %18 = vector.shape_cast %15 : vector<2x2x256xf32> to vector<2x1x2x256xf32>
    tpu.vector_store %arg3[%c0_17, %c1_18, %c0_19, %c0_20], %18 {strides = array<i32>} : memref<2x2x2x256xf32, #tpu.memory_space<vmem>>, vector<2x1x2x256xf32>,
    return
  }
  func.func @transform_0(%arg0: i32, %arg1: i32) -> (i32, i32, i32, i32) {
    %c0_i32 = arith.constant 0 : i32
    %c0_i32_0 = arith.constant 0 : i32
    %c0_i32_1 = arith.constant 0 : i32
    return %arg0, %c0_i32, %arg1, %c0_i32_0 : i32, i32, i32, i32
  }
  func.func @transform_1(%arg0: i32, %arg1: i32) -> (i32, i32, i32, i32) {
    %c0_i32 = arith.constant 0 : i32
    %c0_i32_0 = arith.constant 0 : i32
    %c0_i32_1 = arith.constant 0 : i32
    return %arg0, %c0_i32, %arg1, %c0_i32_0 : i32, i32, i32, i32
  }
}

</mosaic_0001>

<bundles_post_ra>
// kernel: tpu_custom_call.1
= control target key start
LH: loop header
LB: loop body
LE: loop exit
PB: predicated region body
PF: predicated region fallthrough
CT: control target
= control target key end

     0   :  { %6 = vsyncpa [#allocation3], 0  ;;  %s152_s0 = inlined_call_operand.hbm [shape: f32[2,2,2,512], index: 0, kind: input, shape index: {}]   ;;  %s153_s1 = inlined_call_operand.hbm [shape: f32[2,2,2,256], index: 1, kind: output, shape index: {}]  }
   0x1   :  { %7 = vsyncpa [#allocation4], 0  ;;  %s130_s6 = smov [#allocation2]  }
   0x2   :  { %s13_s7 = sshll.u32 %s130_s6, 4  ;;  %s14_s7 = int_to_ptr.vmem [resolvable:$true] %s13_s7 }
   0x3   :  { %s94_s8 = scalar_lea.vmem %s14_s7, 512  ;;  %p99_p1 = scmp.lt.s32.totalorder %s14_s7, %s14_s7 }
   0x4   :  { %p95_p0 = scmp.ne.s32.totalorder %s14_s7, %s94_s8  ;;  %p100_p2 = scmp.lt.s32.totalorder %s94_s8, %s94_s8 }
   0x6   :  { %p101_p3 = por %p100_p2, %p99_p1 }
   0x8   :  { %p102_p4 = pnand %p101_p3, %p95_p0 }
   0xa   :  { %105 = shalt.err (!%p102_p4)
}
   0xb   :  { %s131_s9 = smov 128   ;;  %s132_s10 = smov 8  }
   0xc   :  { %19 = dma.hbm_to_vmem [thread:$0]  %s152_s0, 512, %s14_s7, [#allocation3], %s131_s9, %s131_s9, %s132_s10  }
   0xd   :  { %126 = dma.done.wait [#allocation3], 512  }
   0xe   :  { %127 = vsyncadd [#allocation3], 4294966784  ;;  %v23_v0 = vld [vmem:[#allocation2] sm:$0xf]  ;;  %v25_v1 = vld [vmem:[#allocation2 + $0x4] sm:$0xf] }
   0xf   :  { %v24_v2 = vld [vmem:[#allocation2 + $0x10] sm:$0xf]  ;;  %v27_v3 = vmax.f32 %v23_v0, %v25_v1  ;;  %v26_v4 = vld [vmem:[#allocation2 + $0x14] sm:$0xf]  ;;  %v32_v5 = vld [vmem:[#allocation2 + $0x8] sm:$0xf] }
  0x10   :  { %v34_v6 = vld [vmem:[#allocation2 + $0xc] sm:$0xf]  ;;  %v28_v7 = vmax.f32 %v24_v2, %v26_v4  ;;  %v36_v8 = vmul.f32 %v32_v5, %v32_v5  ;;  %v33_v10 = vld [vmem:[#allocation2 + $0x18] sm:$0xf]  ;;  %v35_v11 = vld [vmem:[#allocation2 + $0x1c] sm:$0xf] }
  0x11   :  { %v38_v9 = vmul.f32 %v34_v6, %v34_v6  ;;  %29 = vst [vmem:[#allocation5] sm:$0xf] %v27_v3  ;;  %v37_v12 = vmul.f32 %v33_v10, %v33_v10  ;;  %v39_v13 = vmul.f32 %v35_v11, %v35_v11  ;;  %s133_s0 = smov [#allocation5]  }
  0x12   :  { %30 = vst [vmem:[#allocation5 + $0x8] sm:$0xf] %v28_v7  ;;  %s64_s13 = sshll.u32 %s133_s0, 4  ;;  %s65_s13 = int_to_ptr.vmem [resolvable:$true] %s64_s13 }
  0x13   :  { %v40_v14 = vadd.f32 %v38_v9, %v36_v8  ;;  %v41_v15 = vadd.f32 %v39_v13, %v37_v12  ;;  %s106_s14 = scalar_lea.vmem %s65_s13, 256  ;;  %p111_p6 = scmp.lt.s32.totalorder %s65_s13, %s65_s13 }
  0x14   :  { %p107_p5 = scmp.ne.s32.totalorder %s65_s13, %s106_s14  ;;  %p112_p7 = scmp.lt.s32.totalorder %s106_s14, %s106_s14 }
  0x15   :  { %82 = vrsqrt.f32 %v40_v14  ;;  %vm44_vm0 = vcmp.eq.f32.partialorder %v40_v14, inf  ;;  %v47_v17 = vand.u32 2147483648, %v40_v14  ;;  %vm46_vm1 = vcmp.eq.f32.partialorder %v40_v14, 0.0 }
  0x16   :  { %84 = vrsqrt.f32 %v41_v15  ;;  %vm51_vm2 = vcmp.eq.f32.partialorder %v41_v15, inf  ;;  %v54_v20 = vand.u32 2147483648, %v41_v15  ;;  %vm53_vm3 = vcmp.eq.f32.partialorder %v41_v15, 0.0  ;;  %p113_p8 = por %p112_p7, %p111_p6 }
  0x18   :  { %p114_p9 = pnand %p113_p8, %p107_p5 }
  0x22   :  { %v83_v16 = vpop.eup %82 }
  0x23   :  { %v85_v18 = vpop.eup %84  ;;  %v43_v19 = vmul.f32 %v83_v16, %v40_v14 }
  0x24   :  { %v50_v21 = vmul.f32 %v85_v18, %v41_v15 }
  0x25   :  { %v45_v22 = vsel %vm44_vm0, %v40_v14, %v43_v19 }
  0x26   :  { %v48_v23 = vsel %vm46_vm1, %v47_v17, %v45_v22  ;;  %v52_v24 = vsel %vm51_vm2, %v41_v15, %v50_v21 }
  0x27   :  { %57 = vst [vmem:[#allocation5 + $0x4] sm:$0xf] %v48_v23  ;;  %v55_v25 = vsel %vm53_vm3, %v54_v20, %v52_v24 }
  0x28   :  { %58 = vst [vmem:[#allocation5 + $0xc] sm:$0xf] %v55_v25 }
  0x29   :  { %117 = shalt.err (!%p114_p9)
}
  0x2a   :  { %s134_s15 = smov 64   ;;  %s135_s16 = smov 4  }
  0x2b   :  { %70 = dma.vmem_to_hbm [thread:$0]  %s65_s13, 256, %s153_s1, [#allocation4], %s134_s15, %s134_s15, %s135_s16  }
  0x2c   :  { %128 = dma.done.wait [#allocation4], 256  }
  0x2d   :  { %129 = vsyncadd [#allocation4], 4294967040 }
  0x2e   :  { %74 = vsyncpa [#allocation3], 1 }
  0x2f   :  { %75 = vsyncpa [#allocation4], 1 }

</bundles_post_ra>
